<compile_context>
chip_gen: v7x
topology: tpu7x:2x2x1
jax: 0.10.0
libtpu: 0.0.40
codegen_flags: <defaults>
</compile_context>

<pallas_src>
import functools
import math

import jax
import jax.numpy as jnp
from jax import lax
from jax.experimental import pallas as pl
from jax.experimental.pallas import tpu as pltpu


# splitmix32-style mixer in int32 arithmetic (wrap-around multiplies;
# arithmetic-shift + mask == logical shift).  Pure jnp ops only.
_MIX_C1 = 0x7FEB352D                 # fits in positive int32
_MIX_C2 = 0x846CA68B - (1 << 32)     # as signed int32
_GOLDEN = 0x9E3779B9 - (1 << 32)     # golden-ratio odd constant


def _mix32(x):
    x = x ^ ((x >> 16) & jnp.int32(0x0000FFFF))
    x = x * jnp.int32(_MIX_C1)
    x = x ^ ((x >> 15) & jnp.int32(0x0001FFFF))
    x = x * jnp.int32(_MIX_C2)
    x = x ^ ((x >> 16) & jnp.int32(0x0000FFFF))
    return x


def _attn_kernel(seed_ref, x1_ref, x2_ref, o_ref, acc_ref, m_ref, l_ref, *,
                 scaling, p_drop, m_total, n_total, use_bf16):
    """One grid step: HB heads x TM query rows x TN key columns.

    x1_ref: (HB, TM, D) queries | x2_ref: (HB, TN, D) keys/values
    o_ref : (HB, TM, D)         | acc/m/l: f32 VMEM scratch (online softmax)
    """
    hb, tm, _ = x1_ref.shape
    tn = x2_ref.shape[1]
    kv_step = pl.program_id(2)

    @pl.when(kv_step == 0)
    def _():
        m_ref[...] = jnp.full(m_ref.shape, -jnp.inf, dtype=m_ref.dtype)
        l_ref[...] = jnp.zeros(l_ref.shape, dtype=l_ref.dtype)
        acc_ref[...] = jnp.zeros(acc_ref.shape, dtype=acc_ref.dtype)

    q = x1_ref[...]
    kv = x2_ref[...]

    # Fold the scaling factor into q: M*D multiply instead of M*N.
    if scaling != 1.0:
        q = q * jnp.asarray(scaling, dtype=q.dtype)

    # bf16 MXU operands for f32 inputs (f32 accumulation below).
    if use_bf16 and q.dtype == jnp.float32:
        q = q.astype(jnp.bfloat16)
        kv = kv.astype(jnp.bfloat16)

    n_partial = (n_total % tn) != 0
    if n_partial:
        # Zero out-of-range key/value rows so padded garbage can't poison the
        # matmuls; their scores are forced to -inf below.
        col_kv = lax.broadcasted_iota(jnp.int32, (1, tn, 1), 1) + kv_step * tn
        kv = jnp.where(col_kv < n_total, kv, jnp.zeros((), kv.dtype))

    # s[h,m,n] = sum_d q[h,m,d] * kv[h,n,d] — contract the shared D axis
    # directly (no kv.T), batched dot_general on the MXU, f32 accumulate.
    s = jnp.einsum("hmd,hnd->hmn", q, kv, preferred_element_type=jnp.float32)

    if n_partial:
        col_s = lax.broadcasted_iota(jnp.int32, (1, 1, tn), 2) + kv_step * tn
        s = jnp.where(col_s < n_total, s, -jnp.inf)

    # Online softmax statistics (f32).
    m_prev = m_ref[...]
    m_new = jnp.maximum(m_prev, jnp.max(s, axis=-1, keepdims=True))
    alpha = jnp.exp(m_prev - m_new)
    p_t = jnp.exp(s - m_new)
    l_ref[...] = alpha * l_ref[...] + jnp.sum(p_t, axis=-1, keepdims=True)
    m_ref[...] = m_new

    # Dropout is applied to the (unnormalized) softmax numerator; the softmax
    # denominator keeps all terms and the 1/(1-p) rescale is folded into the
    # epilogue.  Keep-mask = hash(seed, global head/row/col) in integer space.
    if 0.0 < p_drop < 1.0:
        h_idx = lax.broadcasted_iota(jnp.int32, s.shape, 0) + pl.program_id(0) * hb
        r_idx = lax.broadcasted_iota(jnp.int32, s.shape, 1) + pl.program_id(1) * tm
        c_idx = lax.broadcasted_iota(jnp.int32, s.shape, 2) + kv_step * tn
        lin = (h_idx * jnp.int32(m_total) + r_idx) * jnp.int32(n_total) + c_idx
        bits = _mix32(lin + seed_ref[0] * jnp.int32(_GOLDEN))
        # keep iff bits >= thresh with P(keep) = 1 - p (signed threshold).
        thresh = int(round(p_drop * (1 << 32))) - (1 << 31)
        thresh = max(-(1 << 31), min(thresh, (1 << 31) - 1))
        p_t = jnp.where(bits >= jnp.int32(thresh), p_t, 0.0)

    acc_ref[...] = alpha * acc_ref[...] + jnp.einsum(
        "hmn,hnd->hmd", p_t.astype(kv.dtype), kv,
        preferred_element_type=jnp.float32)

    @pl.when(kv_step == pl.num_programs(2) - 1)
    def _():
        # EUP approximate reciprocal (~2^-12 rel err) for the softmax denom.
        out = acc_ref[...] * pl.reciprocal(l_ref[...], approx=True)
        if 0.0 < p_drop < 1.0:
            out = out * jnp.float32(1.0 / (1.0 - p_drop))   # M*D, not M*N
        o_ref[...] = out.astype(o_ref.dtype)


def _vmem_capacity_bytes(default=64 * 1024 * 1024):
    try:
        cap = int(pltpu.get_tpu_info().vmem_capacity_bytes)
        if cap > 0:
            return cap
    except Exception:
        pass
    return default


def model_forward(x1, x2, *, scaling_factor=1.0, dropout_p=1.0, seed=0,
                  use_bf16_matmul=True):
    """Pallas implementation of Model.forward.

    x1: (..., M, D), x2: (..., N, D)  ->  output (..., M, D)
    """
    *batch, M, D = x1.shape
    *batch2, N, D2 = x2.shape
    assert list(batch) == list(batch2) and D == D2, "incompatible shapes"
    BH = int(math.prod(batch)) if batch else 1

    # F.dropout(p=1, training=True) zeroes the attention weights -> the whole
    # forward is exactly zero; skip the kernel launch entirely.
    if float(dropout_p) >= 1.0:
        return jnp.zeros((*batch, M, D), dtype=x1.dtype)

    x1f = x1.reshape(BH, M, D)
    x2f = x2.reshape(BH, N, D)
    seed_arr = jnp.array([int(seed)], dtype=jnp.int32)

    # --- generation-aware VMEM budgeting (v7x 64 MiB vs v5e/v6e 128 MiB) ----
    vmem_cap = _vmem_capacity_bytes()
    tile_budget = int(vmem_cap * 0.55)      # footprint target (incl. dbl-buffer)
    vmem_limit = int(vmem_cap * 0.85)       # explicit scoped-VMEM limit

    itemsize = max(jnp.dtype(x1.dtype).itemsize, 1)

    # Fixed tile sizes + cdiv grids (Pallas masks partial boundary blocks;
    # out-of-range key columns additionally masked in-kernel).
    TM = M if M <= 256 else 256             # query rows per step
    TN = N if N <= 512 else 512             # key/value rows per step

    def footprint(hb):
        io = 2 * (2 * TM * D + TN * D) * itemsize * hb      # double-buffered tiles
        scratch = (TM * D + 2 * TM) * 4 * hb                # acc + m/l (f32)
        inter = 5 * TM * TN * 4 * hb                        # scores/exp/bits/masks
        return io + scratch + inter

    HB = max(1, min(BH, tile_budget // max(footprint(1), 1)))
    # v7x megacore: keep >= 2 grid steps along a "parallel" axis when possible.
    if M <= TM and BH >= 2:
        HB = min(HB, pl.cdiv(BH, 2))

    grid = (pl.cdiv(BH, HB), pl.cdiv(M, TM), pl.cdiv(N, TN))

    kernel = functools.partial(
        _attn_kernel,
        scaling=float(scaling_factor),
        p_drop=float(dropout_p),
        m_total=M, n_total=N,
        use_bf16=bool(use_bf16_matmul),
    )

    out = pl.pallas_call(
        kernel,
        out_shape=jax.ShapeDtypeStruct((BH, M, D), x1.dtype),
        grid_spec=pltpu.PrefetchScalarGridSpec(
            num_scalar_prefetch=1,
            grid=grid,
            in_specs=[
                pl.BlockSpec((HB, TM, D), lambda h, i, k, seed: (h, i, 0)),
                pl.BlockSpec((HB, TN, D), lambda h, i, k, seed: (h, k, 0)),
            ],
            out_specs=pl.BlockSpec((HB, TM, D), lambda h, i, k, seed: (h, i, 0)),
            scratch_shapes=[
                pltpu.VMEM((HB, TM, D), jnp.float32),   # output accumulator
                pltpu.VMEM((HB, TM, 1), jnp.float32),   # running max
                pltpu.VMEM((HB, TM, 1), jnp.float32),   # running sum
            ],
        ),
        compiler_params=pltpu.CompilerParams(
            # head-blocks / query-tiles independent -> shard across v7x's two
            # TensorCores; the key axis carries the online-softmax reduction.
            dimension_semantics=("parallel", "parallel", "arbitrary"),
            vmem_limit_bytes=vmem_limit,
        ),
    )(seed_arr, x1f, x2f)

    return out.reshape(*batch, M, D)


if __name__ == "__main__":
    # Module hyper-parameters from the PyTorch script.
    scaling_factor = 1
    dropout = 1   # F.dropout(p=1, training=True) -> all-zero attention weights

    # The script's sample tensors (1,32,4,4) x (1,32,10,10) are shape-
    # incompatible for the matmul, so use small consistent shapes instead:
    # x1: (B, H, M, D), x2: (B, H, N, D).
    B, H, M, N, D = 2, 4, 8, 16, 16
    key = jax.random.PRNGKey(0)
    k1, k2 = jax.random.split(key)
    x1 = jax.random.normal(k1, (B, H, M, D), dtype=jnp.float32)
    x2 = jax.random.normal(k2, (B, H, N, D), dtype=jnp.float32)

    # 1) Module default config (p=1): exact-zero output, no kernel launch.
    out_p1 = jax.block_until_ready(
        model_forward(x1, x2, scaling_factor=scaling_factor,
                      dropout_p=dropout, seed=0))
    assert out_p1.shape == (B, H, M, D)
    assert bool(jnp.all(out_p1 == 0.0)), "p=1 dropout must zero the output"

    # 2) p=0 (no dropout), f32 MXU path: tight check vs pure-JAX reference.
    out_p0 = jax.block_until_ready(
        model_forward(x1, x2, scaling_factor=scaling_factor,
                      dropout_p=0.0, seed=0, use_bf16_matmul=False))
    qk = jnp.einsum("bhmd,bhnd->bhmn", x1, x2) * scaling_factor
    ref = jnp.einsum("bhmn,bhnd->bhmd", jax.nn.softmax(qk, axis=-1), x2)
    assert out_p0.shape == ref.shape
    assert bool(jnp.allclose(out_p0, ref, atol=2e-2, rtol=2e-2)), \
        "mismatch vs reference (p=0, f32 MXU)"

    # 2b) default bf16-MXU path (perf config), looser tolerance.
    out_bf = jax.block_until_ready(
        model_forward(x1, x2, scaling_factor=scaling_factor,
                      dropout_p=0.0, seed=0))
    assert bool(jnp.allclose(out_bf, ref, atol=6e-2, rtol=6e-2)), \
        "mismatch vs reference (p=0, bf16 MXU)"

    # 3) 0 < p < 1: exercises the in-kernel hash-based dropout path.
    out_p5 = jax.block_until_ready(
        model_forward(x1, x2, scaling_factor=scaling_factor,
                      dropout_p=0.5, seed=1234))
    assert out_p5.shape == (B, H, M, D)
    assert bool(jnp.all(jnp.isfinite(out_p5)))

    print("KERNEL_OK")
</pallas_src>

<mosaic_0001>
module attributes {stable_mosaic.version = 11 : i64} {
  func.func @_attn_kernel(%arg0: i32, %arg1: i32, %arg2: i32, %arg3: memref<1xi32, #tpu.memory_space<smem>>, %arg4: memref<4x8x16xf32, #tpu.memory_space<vmem>>, %arg5: memref<4x16x16xf32, #tpu.memory_space<vmem>>, %arg6: memref<4x8x16xf32, #tpu.memory_space<vmem>>, %arg7: memref<4x8x16xf32, #tpu.memory_space<vmem>>, %arg8: memref<4x8x1xf32, #tpu.memory_space<vmem>>, %arg9: memref<4x8x1xf32, #tpu.memory_space<vmem>>) attributes {dimension_semantics = [#tpu.dimension_semantics<parallel>, #tpu.dimension_semantics<parallel>, #tpu.dimension_semantics<arbitrary>], iteration_bounds = array<i64: 2, 1, 1>, scalar_prefetch = 1 : i64, scratch_operands = 3 : i64, tpu.core_type = #tpu.core_type<tc>, window_params = [{transform_indices = @transform_0, window_bounds = array<i64: 4, 8, 16>}, {transform_indices = @transform_1, window_bounds = array<i64: 4, 16, 16>}, {transform_indices = @transform_2, window_bounds = array<i64: 4, 8, 16>}]} {
    %c0_i32 = arith.constant 0 : i32
    %0 = arith.cmpi eq, %arg2, %c0_i32 : i32
    %1 = arith.extui %0 : i1 to i32
    %c0_i32_0 = arith.constant 0 : i32
    %2 = arith.cmpi ne, %1, %c0_i32_0 : i32
    scf.if %2 {
      %cst_29 = arith.constant 0xFF800000 : f32
      %31 = vector.broadcast %cst_29 : f32 to vector<4x8x1xf32>
      %c0_30 = arith.constant 0 : index
      %c0_31 = arith.constant 0 : index
      %c0_32 = arith.constant 0 : index
      %32 = vector.load %arg8[%c0_30, %c0_31, %c0_32] : memref<4x8x1xf32, #tpu.memory_space<vmem>>, vector<4x8x1xf32>
      tpu.vector_store %arg8[%c0_30, %c0_31, %c0_32], %31 {strides = array<i32>} : memref<4x8x1xf32, #tpu.memory_space<vmem>>, vector<4x8x1xf32>,
      %cst_33 = arith.constant 0.000000e+00 : f32
      %33 = vector.broadcast %cst_33 : f32 to vector<4x8x1xf32>
      %c0_34 = arith.constant 0 : index
      %c0_35 = arith.constant 0 : index
      %c0_36 = arith.constant 0 : index
      %34 = vector.load %arg9[%c0_34, %c0_35, %c0_36] : memref<4x8x1xf32, #tpu.memory_space<vmem>>, vector<4x8x1xf32>
      tpu.vector_store %arg9[%c0_34, %c0_35, %c0_36], %33 {strides = array<i32>} : memref<4x8x1xf32, #tpu.memory_space<vmem>>, vector<4x8x1xf32>,
      %cst_37 = arith.constant 0.000000e+00 : f32
      %35 = vector.broadcast %cst_37 : f32 to vector<4x8x16xf32>
      %c0_38 = arith.constant 0 : index
      %c0_39 = arith.constant 0 : index
      %c0_40 = arith.constant 0 : index
      %36 = vector.load %arg7[%c0_38, %c0_39, %c0_40] : memref<4x8x16xf32, #tpu.memory_space<vmem>>, vector<4x8x16xf32>
      tpu.vector_store %arg7[%c0_38, %c0_39, %c0_40], %35 {strides = array<i32>} : memref<4x8x16xf32, #tpu.memory_space<vmem>>, vector<4x8x16xf32>,
    } else {
    }
    %c0 = arith.constant 0 : index
    %c0_1 = arith.constant 0 : index
    %c0_2 = arith.constant 0 : index
    %3 = vector.load %arg4[%c0, %c0_1, %c0_2] : memref<4x8x16xf32, #tpu.memory_space<vmem>>, vector<4x8x16xf32>
    %c0_3 = arith.constant 0 : index
    %c0_4 = arith.constant 0 : index
    %c0_5 = arith.constant 0 : index
    %4 = vector.load %arg5[%c0_3, %c0_4, %c0_5] : memref<4x16x16xf32, #tpu.memory_space<vmem>>, vector<4x16x16xf32>
    "tpu.trace_start"() <{level = 10 : i32, message = "hmd,hnd->hmn"}> : () -> ()
    %cst = arith.constant dense<0.000000e+00> : vector<4x8x16xf32>
    %5 = tpu.matmul %3, %4, %cst {dimension_numbers = #tpu.dot_dimension_numbers<[2], [2], [1], [1], [0, 0, 0, 1, 1, 1], [0], [0]>} : vector<4x8x16xf32>, vector<4x16x16xf32>, vector<4x8x16xf32> -> vector<4x8x16xf32>
    "tpu.trace_stop"() : () -> ()
    %c0_6 = arith.constant 0 : index
    %c0_7 = arith.constant 0 : index
    %c0_8 = arith.constant 0 : index
    %6 = vector.load %arg8[%c0_6, %c0_7, %c0_8] : memref<4x8x1xf32, #tpu.memory_space<vmem>>, vector<4x8x1xf32>
    %cst_9 = arith.constant dense<0xFF800000> : vector<4x8xf32>
    %7 = vector.multi_reduction <maximumf>, %5, %cst_9 [2] : vector<4x8x16xf32> to vector<4x8xf32>
    %8 = vector.shape_cast %7 : vector<4x8xf32> to vector<4x8x1xf32>
    %9 = arith.maximumf %6, %8 : vector<4x8x1xf32>
    %10 = arith.subf %6, %9 : vector<4x8x1xf32>
    %11 = math.exp %10 : vector<4x8x1xf32>
    %12 = vector.broadcast %9 : vector<4x8x1xf32> to vector<4x8x16xf32>
    %13 = arith.subf %5, %12 : vector<4x8x16xf32>
    %14 = math.exp %13 : vector<4x8x16xf32>
    %c0_10 = arith.constant 0 : index
    %c0_11 = arith.constant 0 : index
    %c0_12 = arith.constant 0 : index
    %15 = vector.load %arg9[%c0_10, %c0_11, %c0_12] : memref<4x8x1xf32, #tpu.memory_space<vmem>>, vector<4x8x1xf32>
    %16 = arith.mulf %11, %15 : vector<4x8x1xf32>
    %cst_13 = arith.constant dense<0.000000e+00> : vector<4x8xf32>
    %17 = vector.multi_reduction <add>, %14, %cst_13 [2] : vector<4x8x16xf32> to vector<4x8xf32>
    %18 = vector.shape_cast %17 : vector<4x8xf32> to vector<4x8x1xf32>
    %19 = arith.addf %16, %18 : vector<4x8x1xf32>
    %c0_14 = arith.constant 0 : index
    %c0_15 = arith.constant 0 : index
    %c0_16 = arith.constant 0 : index
    %20 = vector.load %arg9[%c0_14, %c0_15, %c0_16] : memref<4x8x1xf32, #tpu.memory_space<vmem>>, vector<4x8x1xf32>
    tpu.vector_store %arg9[%c0_14, %c0_15, %c0_16], %19 {strides = array<i32>} : memref<4x8x1xf32, #tpu.memory_space<vmem>>, vector<4x8x1xf32>,
    %c0_17 = arith.constant 0 : index
    %c0_18 = arith.constant 0 : index
    %c0_19 = arith.constant 0 : index
    %21 = vector.load %arg8[%c0_17, %c0_18, %c0_19] : memref<4x8x1xf32, #tpu.memory_space<vmem>>, vector<4x8x1xf32>
    tpu.vector_store %arg8[%c0_17, %c0_18, %c0_19], %9 {strides = array<i32>} : memref<4x8x1xf32, #tpu.memory_space<vmem>>, vector<4x8x1xf32>,
    %c0_20 = arith.constant 0 : index
    %c0_21 = arith.constant 0 : index
    %c0_22 = arith.constant 0 : index
    %22 = vector.load %arg7[%c0_20, %c0_21, %c0_22] : memref<4x8x16xf32, #tpu.memory_space<vmem>>, vector<4x8x16xf32>
    %23 = vector.broadcast %11 : vector<4x8x1xf32> to vector<4x8x16xf32>
    %24 = arith.mulf %23, %22 : vector<4x8x16xf32>
    "tpu.trace_start"() <{level = 10 : i32, message = "hmn,hnd->hmd"}> : () -> ()
    %cst_23 = arith.constant dense<0.000000e+00> : vector<4x8x16xf32>
    %25 = tpu.matmul %14, %4, %cst_23 {dimension_numbers = #tpu.dot_dimension_numbers<[2], [1], [1], [2], [0, 0, 0, 1, 1, 2], [0], [0]>} : vector<4x8x16xf32>, vector<4x16x16xf32>, vector<4x8x16xf32> -> vector<4x8x16xf32>
    "tpu.trace_stop"() : () -> ()
    %26 = arith.addf %24, %25 : vector<4x8x16xf32>
    %c0_24 = arith.constant 0 : index
    %c0_25 = arith.constant 0 : index
    %c0_26 = arith.constant 0 : index
    %27 = vector.load %arg7[%c0_24, %c0_25, %c0_26] : memref<4x8x16xf32, #tpu.memory_space<vmem>>, vector<4x8x16xf32>
    tpu.vector_store %arg7[%c0_24, %c0_25, %c0_26], %26 {strides = array<i32>} : memref<4x8x16xf32, #tpu.memory_space<vmem>>, vector<4x8x16xf32>,
    %c0_i32_27 = arith.constant 0 : i32
    %28 = arith.cmpi eq, %arg2, %c0_i32_27 : i32
    %29 = arith.extui %28 : i1 to i32
    %c0_i32_28 = arith.constant 0 : i32
    %30 = arith.cmpi ne, %29, %c0_i32_28 : i32
    scf.if %30 {
      %c0_29 = arith.constant 0 : index
      %c0_30 = arith.constant 0 : index
      %c0_31 = arith.constant 0 : index
      %31 = vector.load %arg7[%c0_29, %c0_30, %c0_31] : memref<4x8x16xf32, #tpu.memory_space<vmem>>, vector<4x8x16xf32>
      %c0_32 = arith.constant 0 : index
      %c0_33 = arith.constant 0 : index
      %c0_34 = arith.constant 0 : index
      %32 = vector.load %arg9[%c0_32, %c0_33, %c0_34] : memref<4x8x1xf32, #tpu.memory_space<vmem>>, vector<4x8x1xf32>
      %33 = tpu.reciprocal %32 {approx = true} : vector<4x8x1xf32> -> vector<4x8x1xf32>
      %34 = vector.broadcast %33 : vector<4x8x1xf32> to vector<4x8x16xf32>
      %35 = arith.mulf %31, %34 : vector<4x8x16xf32>
      %c0_35 = arith.constant 0 : index
      %c0_36 = arith.constant 0 : index
      %c0_37 = arith.constant 0 : index
      %36 = vector.load %arg6[%c0_35, %c0_36, %c0_37] : memref<4x8x16xf32, #tpu.memory_space<vmem>>, vector<4x8x16xf32>
      tpu.vector_store %arg6[%c0_35, %c0_36, %c0_37], %35 {strides = array<i32>} : memref<4x8x16xf32, #tpu.memory_space<vmem>>, vector<4x8x16xf32>,
    } else {
    }
    return
  }
  func.func @transform_0(%arg0: i32, %arg1: i32, %arg2: i32, %arg3: memref<1xi32, #tpu.memory_space<smem>>) -> (i32, i32, i32) {
    %c0_i32 = arith.constant 0 : i32
    %c0_i32_0 = arith.constant 0 : i32
    return %arg0, %arg1, %c0_i32 : i32, i32, i32
  }
  func.func @transform_1(%arg0: i32, %arg1: i32, %arg2: i32, %arg3: memref<1xi32, #tpu.memory_space<smem>>) -> (i32, i32, i32) {
    %c0_i32 = arith.constant 0 : i32
    %c0_i32_0 = arith.constant 0 : i32
    return %arg0, %arg2, %c0_i32 : i32, i32, i32
  }
  func.func @transform_2(%arg0: i32, %arg1: i32, %arg2: i32, %arg3: memref<1xi32, #tpu.memory_space<smem>>) -> (i32, i32, i32) {
    %c0_i32 = arith.constant 0 : i32
    %c0_i32_0 = arith.constant 0 : i32
    return %arg0, %arg1, %c0_i32 : i32, i32, i32
  }
}

</mosaic_0001>

<bundles_post_ra>
// kernel: tpu_custom_call.1
= control target key start
LH: loop header
LB: loop body
LE: loop exit
PB: predicated region body
PF: predicated region fallthrough
CT: control target
= control target key end

     0   :  { %9 = vsyncpa [#allocation8], 0  ;;  %s1942_s0 = inlined_call_operand.<no memory space> [shape: s32[1], index: 0, kind: input, shape index: {}]   ;;  %s1943_s1 = inlined_call_operand.hbm [shape: f32[8,8,16], index: 1, kind: input, shape index: {}]   ;;  %s1944_s2 = inlined_call_operand.hbm [shape: f32[8,16,16], index: 2, kind: input, shape index: {}]   ;;  %s1945_s3 = inlined_call_operand.hbm [shape: f32[8,8,16], index: 3, kind: output, shape index: {}]  }
   0x1   :  { %11 = vsyncpa [#allocation8 + $0x1], 0 }
   0x2   :  { %12 = vsyncpa [#allocation11], 0 }
   0x3   :  { %14 = vsyncpa [#allocation11 + $0x1], 0 }
   0x4   :  { %15 = vsyncpa [#allocation9], 0 }
   0x5   :  { %17 = vsyncpa [#allocation9 + $0x1], 0  ;;  %s1611_s12 = smov 0   ;;  %s1613_s13 = smov 0  }
   0x6   :  { %s1615_s0 = smov 0   ;;  %s1617_s14 = smov 0  }
   0x7   :  { %s1619_s15 = smov 0   ;;  %s1621_s16 = smov 0  }
   0x8 LB: > { %s1181_s17 = sadd.s32 4294967295, %s1577_s16   ;;  %s1182_s18 = sadd.s32 4294967294, %s1577_s16   ;;  %s1577_s16 = sphi %s1621_s16, %s23_s16   ;;  %s1573_s15 = sphi %s1619_s15, %s1965_s15   ;;  %s1569_s14 = sphi %s1617_s14, %s1964_s14   ;;  %s1565_s0 = sphi %s1615_s0, %s1963_s0   ;;  %s1561_s13 = sphi %s1613_s13, %s1962_s13   ;;  %s1557_s12 = sphi %s1611_s12, %s1961_s12  }
   0x9   : > { %s42_s19 = sadd.s32 1, %s1573_s15  ;;  %s51_s20 = sadd.s32 1, %s1565_s0 }
   0xa   : > { %p44_p0 = scmp.ge.s32.totalorder %s42_s19, 2  ;;  %p58_p1 = scmp.ne.s32.totalorder %s1565_s0, %s1561_s13 }
   0xb   : > { %p59_p2 = scmp.eq.s32.totalorder %s1577_s16, 0  ;;  %p64_p3 = scmp.ne.s32.totalorder %s1561_s13, %s1557_s12 }
   0xc   : > { %s1967_s19 = smov (%p44_p0, %s42_s19), 0  ;;  %p65_p5 = scmp.eq.s32.totalorder %s1181_s17, 0 }
   0xd   : > { %p1652_p4 = por %p59_p2, %p58_p1  ;;  %s46_s22 = ssub.s32 %s1573_s15, %s1967_s19 }
   0xe   : > { %p118_p6 = scmp.eq.s32.totalorder %s1181_s17, 1  ;;  %p49_p7 = scmp.eq.s32.totalorder %s46_s22, 0 }
   0xf   : > { %p1658_p8 = por %p65_p5, %p64_p3  ;;  %p124_p10 = scmp.eq.s32.totalorder %s1182_s18, 1 }
  0x10   : > { %p1662_p9 = por %p118_p6, %p58_p1  ;;  %p1346_p13 = scmp.lt.s32.totalorder %s1577_s16, 2 }
  0x11   : > { %s1949_s23 = scalar_select %p1658_p8, 1, 0 }
  0x12   : > { %s1950_s24 = scalar_select %p1662_p9, 1, 0 }
  0x13   : > { %s1667_s25 = scalar_select %p49_p7, %s1565_s0, %s51_s20  }
  0x14   : > { %p1669_p11 = por %p124_p10, %p64_p3  ;;  %s1676_s27 = sand.u32 1, %s1565_s0  }
  0x15   : > { %s1185_s28 = sshll.u32 %s1676_s27, 5  ;;  %s1217_s29 = sshll.u32 %s1573_s15, 9 }
  0x16   : > { %s1951_s26 = scalar_select %p1669_p11, 1, 0 }
  0x17   : > { %s1683_s5 = scalar_lea.hbm %s1943_s1, %s1217_s29  ;;  %s148_s6 = scalar_lea.vmem [#allocation7], %s1185_s28 }
  0x18   : > { %s156_s7 = sshll.u32 %s148_s6, 4  ;;  %p1689_p0 = pnand %p1346_p13, %p1652_p4  ;;  %s1685_s7 = int_to_ptr.vmem [resolvable:$true] %s156_s7 }
  0x19   : > { %s145_s9 = scalar_lea.sflag [#allocation8], %s1676_s27  ;;  %s1431_s10 = scalar_lea.hbm %s1683_s5, 512 }
  0x1a   : > { %p1432_p2 = scmp.ne.s32.totalorder %s1683_s5, %s1431_s10  ;;  %p1433_p3 = pneg %p1689_p0 }
  0x1b   : > { %s1436_s18 = scalar_lea.hbm %s1943_s1, 1024  ;;  %p1437_p4 = scmp.lt.u32.totalorder %s1683_s5, %s1943_s1 }
  0x1c   : > { %p1434_p5 = pnand %p1433_p3, %p1432_p2  ;;  %p1438_p7 = scmp.lt.u32.totalorder %s1436_s18, %s1431_s10 }
  0x1d   : > { %p1440_p13 = scmp.lt.u32.totalorder %s1431_s10, %s1683_s5 }
  0x1e   : > { %p1435_p6 = pneg %p1434_p5  ;;  %p1439_p10 = por %p1438_p7, %p1437_p4 }
  0x20   : > { %p1441_p12 = por %p1440_p13, %p1439_p10 }
  0x22   : > { %p1442_p1 = pnand %p1441_p12, %p1435_p6 }
  0x24   : > { %1445 = shalt.err (!%p1442_p1)
}
  0x25   : > { %s1446_s22 = scalar_lea.vmem %s1685_s7, 512  ;;  %s1579_s28 = smov [#allocation7]  }
  0x26   : > { %p1447_p2 = scmp.ne.s32.totalorder %s1685_s7, %s1446_s22  ;;  %s1451_s29 = sshll.u32 %s1579_s28, 4  ;;  %s1452_s29 = int_to_ptr.vmem [resolvable:$false] %s1451_s29 }
  0x27   : > { %s1453_s30 = scalar_lea.vmem %s1452_s29, 1024  ;;  %p1454_p9 = scmp.lt.s32.totalorder %s1685_s7, %s1452_s29 }
  0x28   : > { %p1449_p5 = pnand %p1447_p2, %p1433_p3  ;;  %p1455_p4 = scmp.lt.s32.totalorder %s1453_s30, %s1446_s22 }
  0x2a   : > { %p1450_p11 = pneg %p1449_p5  ;;  %p1456_p7 = por %p1455_p4, %p1454_p9 }
  0x2c   : > { %p1457_p10 = pnand %p1456_p7, %p1450_p11 }
  0x2e   : > { %1460 = shalt.err (!%p1457_p10)
}
  0x2f   : > { %s1580_s4 = smov 128   ;;  %s1581_s6 = smov 8  }
  0x30   : > { %1338 = dma.hbm_to_vmem [thread:$0]  (!%p1689_p0), %s1683_s5, 512, %s1685_s7, %s145_s9, %s1580_s4, %s1580_s4, %s1581_s6  }
  0x31   : > { %p188_p9 = scmp.lt.s32.totalorder %s1577_s16, 3  ;;  %s1188_s10 = sshll.u32 %s1676_s27, 6 }
  0x32   : > { %s1219_s11 = sshll.u32 %s1573_s15, 10  ;;  %p1953_p11 = scmp.ge.s32.totalorder %s1577_s16, 1 }
  0x33   : > { %s1737_s21 = scalar_lea.hbm %s1944_s2, %s1219_s11  ;;  %s170_s22 = scalar_lea.vmem [#allocation10], %s1188_s10 }
  0x34   : > { %p1730_p12 = pnand %p1953_p11, %p188_p9  ;;  %s180_s28 = sshll.u32 %s170_s22, 4  ;;  %s1739_s28 = int_to_ptr.vmem [resolvable:$true] %s180_s28 }
  0x35   : > { %s167_s5 = scalar_lea.sflag [#allocation11], %s1676_s27  ;;  %s1461_s7 = scalar_lea.hbm %s1737_s21, 1024 }
  0x36   : > { %p1462_p1 = scmp.ne.s32.totalorder %s1737_s21, %s1461_s7  ;;  %s1466_s30 = scalar_lea.hbm %s1944_s2, 2048 }
  0x37   : > { %p1467_p2 = scmp.lt.u32.totalorder %s1737_s21, %s1944_s2  ;;  %p1468_p5 = scmp.lt.u32.totalorder %s1466_s30, %s1461_s7 }
  0x38   : > { %p1464_p6 = pnand %p1462_p1, %p1433_p3  ;;  %p1470_p7 = scmp.lt.u32.totalorder %s1461_s7, %s1737_s21 }
  0x39   : > { %p1469_p4 = por %p1468_p5, %p1467_p2 }
  0x3a   : > { %p1465_p13 = pneg %p1464_p6 }
  0x3b   : > { %p1471_p10 = por %p1470_p7, %p1469_p4 }
  0x3d   : > { %p1472_p9 = pnand %p1471_p10, %p1465_p13 }
  0x3f   : > { %1475 = shalt.err (!%p1472_p9)
}
  0x40   : > { %s1476_s10 = scalar_lea.vmem %s1739_s28, 1024  ;;  %s1582_s20 = smov [#allocation10]  }
  0x41   : > { %p1477_p11 = scmp.ne.s32.totalorder %s1739_s28, %s1476_s10  ;;  %s1481_s22 = sshll.u32 %s1582_s20, 4  ;;  %s1482_s22 = int_to_ptr.vmem [resolvable:$false] %s1481_s22 }
  0x42   : > { %s1483_s9 = scalar_lea.vmem %s1482_s22, 2048  ;;  %p1484_p8 = scmp.lt.s32.totalorder %s1739_s28, %s1482_s22 }
  0x43   : > { %p1479_p1 = pnand %p1477_p11, %p1433_p3  ;;  %p1485_p2 = scmp.lt.s32.totalorder %s1483_s9, %s1476_s10 }
  0x45   : > { %p1480_p6 = pneg %p1479_p1  ;;  %p1486_p5 = por %p1485_p2, %p1484_p8 }
  0x47   : > { %p1487_p4 = pnand %p1486_p5, %p1480_p6 }
  0x49   : > { %1490 = shalt.err (!%p1487_p4)
}
  0x4a   : > { %1341 = dma.hbm_to_vmem [thread:$0]  (!%p1689_p0), %s1737_s21, 1024, %s1739_s28, %s167_s5, %s1580_s4, %s1580_s4, %s1581_s6  }
  0x4b   : > { %192 = sbr.rel (%p1730_p12) target bundleno = 918 (0x396), region = 28  ;;  %s1773_s7 = sand.u32 (!%p1730_p12), 1, %s1561_s13  }
  0x4c   : > { %s1193_s29 = sshll.u32 (!%p1730_p12), %s1773_s7, 5  ;;  %s195_s8 = scalar_lea.sflag (!%p1730_p12), [#allocation8], %s1773_s7 }
  0x4d   : > { %s1779_s30 = scalar_lea.vmem (!%p1730_p12), [#allocation7], %s1193_s29  ;;  %p1955_p8 = scmp.ne.s32.totalorder (!%p1730_p12), %s1949_s23, 0 }
  0x52   : > { %1544 = dma.done.wait (%p1955_p8), %s195_s8, 512  }
  0x53   : > { %1546 = vsyncadd (%p1955_p8), %s195_s8, 4294966784  ;;  %s1194_s27 = sshll.u32 %s1773_s7, 6  ;;  %s204_s4 = scalar_lea.sflag [#allocation11], %s1773_s7 }
  0x54   : > { %s207_s6 = scalar_lea.vmem [#allocation10], %s1194_s27 }
  0x55   : > { %1548 = dma.done.wait (%p1955_p8), %s204_s4, 1024  }
  0x56   : > { %1550 = vsyncadd (%p1955_p8), %s204_s4, 4294966272  ;;  %vm250_vm0 = vcmask 130048   ;;  %v1583_v0 = vmov 0.0|0.0   ;;  %v1584_v1 = vmov 0.0   ;;  %vm1585_vm1 = vmmov 0   ;;  %v259_v3 = vld [vmem:[%s207_s6] sm:$0xff] }
  0x57   : > { %1301 = vmatprep.subr.bf16.mxu0 %v1583_v0  ;;  %1305 = vmatprep.subr.bf16.mxu1 %v1583_v0  ;;  %251 = vst.msk [vmem:[#allocation2] sm:$0xff] %vm250_vm0, %v1584_v1  ;;  %252 = vst.msk [vmem:[#allocation2 + $0x8] sm:$0xff] %vm250_vm0, %v1584_v1  ;;  %v260_v4 = vld [vmem:[%s207_s6 + $0x8] sm:$0xff]  ;;  %v261_v5 = vld [vmem:[%s207_s6 + $0x10] sm:$0xff]  ;;  %vm241_vm3 = vcmask 7168   ;;  %v1586_v19 = vmov -inf  }
  0x58   : > { %253 = vst.msk [vmem:[#allocation2 + $0x10] sm:$0xff] %vm250_vm0, %v1584_v1  ;;  %254 = vst.msk [vmem:[#allocation2 + $0x18] sm:$0xff] %vm250_vm0, %v1584_v1  ;;  %1249 = vmatprep.mubr.msk.f32.mxu0 %vm1585_vm1, %v1584_v1  ;;  %1256 = vmatprep.mubr.msk.f32.mxu1 %vm1585_vm1, %v1584_v1  ;;  %v1302_v6 = vpack.c.bf16 %v260_v4, %v259_v3  ;;  %v262_v7 = vld [vmem:[%s207_s6 + $0x18] sm:$0xff]  ;;  %v263_v9 = vld [vmem:[%s207_s6 + $0x20] sm:$0xff]  ;;  %v1587_v32 = vmov 0   ;;  %s232_s23 = scalar_lea.vmem [#allocation12], %s1193_s29 }
  0x59   : > { %vm1805_vm2 = vmpackc.low %vm250_vm0, %vm250_vm0  ;;  %v1306_v8 = vpack.c.bf16 %v262_v7, %v261_v5  ;;  %v264_v10 = vld [vmem:[%s207_s6 + $0x28] sm:$0xff]  ;;  %v265_v11 = vld [vmem:[%s207_s6 + $0x30] sm:$0xff]  ;;  %242 = vst.msk [vmem:[#allocation3] sm:$0xff] %vm241_vm3, %v1586_v19  ;;  %1405 = vset.pattern.permute.xlu0 %v1587_v32  ;;  %1406 = vset.pattern.permute.xlu1 %v1587_v32  ;;  %s1067_s17 = sshll.u32 %s232_s23, 4  ;;  %s1220_s21 = sshll.u32 %s1569_s14, 9  ;;  %s1886_s17 = int_to_ptr.vmem [resolvable:$true] %s1067_s17 }
  0x5a   : > { %1304 = vmatpush3.bf16.xpose.msk.msra.mxu0 %vm1805_vm2, %v1302_v6  ;;  %v266_v12 = vld [vmem:[%s207_s6 + $0x38] sm:$0xff]  ;;  %v255_v13 = vld [vmem:[%s1779_s30] sm:$0xff]  ;;  %v1814_v14 = vpack.c.bf16 %v264_v10, %v263_v9  ;;  %v256_v15 = vld [vmem:[%s1779_s30 + $0x8] sm:$0xff]  ;;  %243 = vst.msk [vmem:[#allocation3 + $0x8] sm:$0xff] %vm241_vm3, %v1586_v19  ;;  %s1892_s11 = scalar_lea.hbm %s1945_s3, %s1220_s21  ;;  %s1053_s18 = scalar_lea.sflag [#allocation9], %s1773_s7 }
  0x5b   : > { %1308 = vmatpush3.bf16.xpose.msk.msra.mxu1 %vm1805_vm2, %v1306_v8  ;;  %1309 = vmatprep.subr.bf16.mxu0 %v1583_v0  ;;  %v1817_v16 = vpack.c.bf16 %v266_v12, %v265_v11  ;;  %v257_v17 = vld [vmem:[%s1779_s30 + $0x10] sm:$0xff]  ;;  %v258_v18 = vld [vmem:[%s1779_s30 + $0x18] sm:$0xff]  ;;  %244 = vst.msk [vmem:[#allocation3 + $0x10] sm:$0xff] %vm241_vm3, %v1586_v19  ;;  %245 = vst.msk [vmem:[#allocation3 + $0x18] sm:$0xff] %vm241_vm3, %v1586_v19  ;;  %s1491_s10 = scalar_lea.vmem %s1886_s17, 512  ;;  %p1958_p3 = scmp.ne.s32.totalorder %s1950_s24, 0 }
  0x5c   : > { %1313 = vmatprep.subr.bf16.mxu1 %v1583_v0  ;;  %246 = vst.msk [vmem:[#allocation4] sm:$0xff] %vm241_vm3, %v1584_v1  ;;  %247 = vst.msk [vmem:[#allocation4 + $0x8] sm:$0xff] %vm241_vm3, %v1584_v1  ;;  %p1492_p0 = scmp.ne.s32.totalorder %s1886_s17, %s1491_s10  ;;  %s1588_s14 = smov [#allocation12]  }
  0x5d   : > { %248 = vst.msk [vmem:[#allocation4 + $0x10] sm:$0xff] %vm241_vm3, %v1584_v1  ;;  %249 = vst.msk [vmem:[#allocation4 + $0x18] sm:$0xff] %vm241_vm3, %v1584_v1  ;;  %s1495_s20 = sshll.u32 %s1588_s14, 4  ;;  %s1496_s20 = int_to_ptr.vmem [resolvable:$false] %s1495_s20 }
  0x5e   : > { %p1493_p12 = pnand %p1492_p0, %p1958_p3  ;;  %s1497_s22 = scalar_lea.vmem %s1496_s20, 1024 }
  0x5f   : > { %p1498_p7 = scmp.lt.s32.totalorder %s1886_s17, %s1496_s20  ;;  %p1499_p10 = scmp.lt.s32.totalorder %s1497_s22, %s1491_s10 }
  0x60   : > { %v584_v33 = vld [vmem:[#allocation3] sm:$0xff]  ;;  %p1494_p13 = pneg %p1493_p12 }
  0x61   : > { %1250 = vmatmul.mubr.msk.f32.vlgmr.msra.gmra.mrb[0].mxu0 %vm250_vm0, %v255_v13  ;;  %v585_v36 = vld [vmem:[#allocation3 + $0x8] sm:$0xff]  ;;  %p1500_p9 = por %p1499_p10, %p1498_p7 }
  0x62   : > { %1312 = vmatpush3.bf16.xpose.msk.msra.mxu0 %vm1805_vm2, %v1814_v14  ;;  %1257 = vmatmul.mubr.msk.f32.vlgmr.msra.gmra.mrb[0].mxu1 %vm250_vm0, %v256_v15  ;;  %v586_v40 = vld [vmem:[#allocation3 + $0x10] sm:$0xff]  ;;  %v587_v44 = vld [vmem:[#allocation3 + $0x18] sm:$0xff] }
  0x63   : > { %1316 = vmatpush3.bf16.xpose.msk.msra.mxu1 %vm1805_vm2, %v1817_v16  ;;  %1263 = vmatprep.mubr.msk.f32.mxu0 %vm1585_vm1, %v1584_v1  ;;  %v648_v13 = vld [vmem:[#allocation4] sm:$0xff]  ;;  %p1501_p11 = pnand %p1500_p9, %p1494_p13 }
  0x64   : > { %1270 = vmatprep.mubr.msk.f32.mxu1 %vm1585_vm1, %v1584_v1  ;;  %1317 = vmatprep.subr.bf16.mxu0 %v1583_v0 }
  0x65   : > { %1320 = vmatprep.subr.bf16.mxu1 %v1583_v0 }
  0x69   : > { %1264 = vmatmul.mubr.msk.f32.vlgmr.msra.gmra.mrb[2].mxu0 %vm250_vm0, %v257_v17 }
  0x6a   : > { %1271 = vmatmul.mubr.msk.f32.vlgmr.msra.gmra.mrb[2].mxu1 %vm250_vm0, %v258_v18  ;;  %1319 = vmatpush3.bf16.msra.mxu0 %v1302_v6 }
  0x6b   : > { %1277 = vmatprep.mubr.msk.f32.mxu0 %vm1585_vm1, %v1584_v1  ;;  %1322 = vmatpush3.bf16.msra.mxu1 %v1306_v8 }
  0x6c   : > { %1284 = vmatprep.mubr.msk.f32.mxu1 %vm1585_vm1, %v1584_v1  ;;  %1323 = vmatprep.subr.bf16.mxu0 %v1583_v0 }
  0x6d   : > { %1326 = vmatprep.subr.bf16.mxu1 %v1583_v0 }
 0x134   : > { %v343_v20 = vpop.f32.mrb[0].mxu0 }
 0x135   : > { %v1251_v21 = vpop.f32.mrb[1].mxu0  ;;  %v588_v22 = vsel %vm250_vm0, %v343_v20, -inf  ;;  %v422_v23 = vpop.f32.mrb[0].mxu1 }
 0x136   : > { %589 = vmax.xlane.f32.xlu0 %v588_v22  ;;  %v1258_v24 = vpop.f32.mrb[1].mxu1  ;;  %v591_v25 = vsel %vm250_vm0, %v422_v23, -inf }
 0x137   : > { %v651_v24 = vld [vmem:[#allocation4 + $0x18] sm:$0xff] }
 0x13a   : > { %592 = vmax.xlane.f32.xlu0 %v591_v25 }
 0x13c   : > { %v501_v26 = vpop.f32.mrb[2].mxu0 }
 0x13d   : > { %v1265_v27 = vpop.f32.mrb[3].mxu0  ;;  %v594_v28 = vsel %vm250_vm0, %v501_v26, -inf  ;;  %v580_v29 = vpop.f32.mrb[2].mxu1 }
 0x13e   : > { %595 = vmax.xlane.f32.xlu1 %v594_v28  ;;  %v1272_v30 = vpop.f32.mrb[3].mxu1  ;;  %v597_v31 = vsel %vm250_vm0, %v580_v29, -inf }
 0x142   : > { %598 = vmax.xlane.f32.xlu1 %v597_v31 }
 0x1c3   : > { %v590_v34 = vpop.xlane.xlu0 %589 }
 0x1c4   : > { %v600_v35 = vmax.f32 %v584_v33, %v590_v34 }
 0x1c6   : > { %v604_v37 = vsub.f32 %v584_v33, %v600_v35  ;;  %677 = vst.msk [vmem:[#allocation3] sm:$0xff] %vm241_vm3, %v600_v35  ;;  %618 = vperm.xlu0 %1405, %v600_v35  }
 0x1c7   : > { %v593_v38 = vpop.xlane.xlu0 %592 }
 0x1c8   : > { %v601_v39 = vmax.f32 %v585_v36, %v593_v38  ;;  %v608_v7 = vmul.f32 1.442695, %v604_v37  ;;  %v681_v37 = vld [vmem:[#allocation2] sm:$0xff] }
 0x1ca   : > { %v605_v41 = vsub.f32 %v585_v36, %v601_v39  ;;  %678 = vst.msk [vmem:[#allocation3 + $0x8] sm:$0xff] %vm241_vm3, %v601_v39  ;;  %623 = vperm.xlu1 %1406, %v601_v39  }
 0x1cb   : > { %v596_v42 = vpop.xlane.xlu1 %595 }
 0x1cc   : > { %v602_v43 = vmax.f32 %v586_v40, %v596_v42  ;;  %v610_v5 = vmul.f32 1.442695, %v605_v41 }
 0x1ce   : > { %v606_v45 = vsub.f32 %v586_v40, %v602_v43  ;;  %679 = vst.msk [vmem:[#allocation3 + $0x10] sm:$0xff] %vm241_vm3, %v602_v43  ;;  %628 = vperm.xlu1 %1406, %v602_v43   ;;  %v682_v40 = vld [vmem:[#allocation2 + $0x8] sm:$0xff] }
 0x1cf   : > { %v599_v46 = vpop.xlane.xlu1 %598 }
 0x1d0   : > { %v603_v47 = vmax.f32 %v587_v44, %v599_v46  ;;  %v612_v8 = vmul.f32 1.442695, %v606_v45 }
 0x1d2   : > { %v607_v48 = vsub.f32 %v587_v44, %v603_v47  ;;  %680 = vst.msk [vmem:[#allocation3 + $0x18] sm:$0xff] %vm241_vm3, %v603_v47  ;;  %633 = vperm.xlu1 %1406, %v603_v47   ;;  %v683_v47 = vld [vmem:[#allocation2 + $0x10] sm:$0xff] }
 0x1d4   : > { %v614_v9 = vmul.f32 1.442695, %v607_v48 }
 0x245   : > { %v619_v49 = vpop.permute.xlu0 %618 }
 0x246   : > { %v636_v50 = vsub.f32 %v343_v20, %v619_v49  ;;  %v650_v20 = vld [vmem:[#allocation4 + $0x10] sm:$0xff] }
 0x248   : > { %v640_v51 = vmul.f32 1.442695, %v636_v50 }
 0x249   : > { %v624_v52 = vpop.permute.xlu1 %623 }
 0x24a   : > { %1407 = vpow2.f32 %v640_v51  ;;  %v637_v53 = vsub.f32 %v422_v23, %v624_v52  ;;  %v684_v52 = vld [vmem:[#allocation2 + $0x18] sm:$0xff] }
 0x24c   : > { %v642_v54 = vmul.f32 1.442695, %v637_v53 }
 0x24d   : > { %v629_v55 = vpop.permute.xlu1 %628 }
 0x24e   : > { %1409 = vpow2.f32 %v642_v54  ;;  %v638_v56 = vsub.f32 %v501_v26, %v629_v55 }
 0x250   : > { %v644_v57 = vmul.f32 1.442695, %v638_v56 }
 0x251   : > { %v634_v58 = vpop.permute.xlu1 %633 }
 0x252   : > { %1411 = vpow2.f32 %v644_v57  ;;  %v639_v59 = vsub.f32 %v580_v29, %v634_v58 }
 0x254   : > { %v1408_v60 = vpop.eup %1407  ;;  %v646_v61 = vmul.f32 1.442695, %v639_v59 }
 0x255   : > { %1278 = vmatmul.mubr.msk.f32.vlgmr.msra.gmra.mrb[4].mxu0 %vm250_vm0, %v1408_v60  ;;  %v656_v62 = vsel %vm250_vm0, %v1408_v60, 0.0 }
 0x256   : > { %1413 = vpow2.f32 %v646_v61  ;;  %657 = vadd.xlane.f32.xlu1 %v656_v62  ;;  %1325 = vmatpush3.bf16.msra.mxu0 %v1814_v14 }
 0x257   : > { %1291 = vmatprep.mubr.msk.f32.mxu0 %vm1585_vm1, %v1584_v1  ;;  %1415 = vpow2.f32 %v610_v5 }
 0x258   : > { %v1410_v63 = vpop.eup %1409  ;;  %1417 = vpow2.f32 %v608_v7 }
 0x259   : > { %1285 = vmatmul.mubr.msk.f32.vlgmr.msra.gmra.mrb[4].mxu1 %vm250_vm0, %v1410_v63  ;;  %v659_v0 = vsel %vm250_vm0, %v1410_v63, 0.0  ;;  %1419 = vpow2.f32 %v612_v8 }
 0x25a   : > { %660 = vadd.xlane.f32.xlu0 %v659_v0  ;;  %1328 = vmatpush3.bf16.msra.mxu1 %v1817_v16  ;;  %1421 = vpow2.f32 %v614_v9  ;;  %v649_v16 = vld [vmem:[#allocation4 + $0x8] sm:$0xff] }
 0x25b   : > { %1298 = vmatprep.mubr.msk.f32.mxu1 %vm1585_vm1, %v1584_v1 }
 0x25c   : > { %v1412_v2 = vpop.eup %1411 }
 0x25d   : > { %1292 = vmatmul.mubr.msk.f32.vlgmr.msra.gmra.mrb[6].mxu0 %vm250_vm0, %v1412_v2  ;;  %v662_v3 = vsel %vm250_vm0, %v1412_v2, 0.0 }
 0x25e   : > { %663 = vadd.xlane.f32.xlu1 %v662_v3 }
 0x260   : > { %v1414_v4 = vpop.eup %1413 }
 0x261   : > { %1299 = vmatmul.mubr.msk.f32.vlgmr.msra.gmra.mrb[6].mxu1 %vm250_vm0, %v1414_v4  ;;  %v665_v6 = vsel %vm250_vm0, %v1414_v4, 0.0  ;;  %v1416_v1 = vpop.eup %1415 }
 0x262   : > { %666 = vadd.xlane.f32.xlu1 %v665_v6  ;;  %v1418_v10 = vpop.eup %1417  ;;  %v653_v18 = vmul.f32 %v1416_v1, %v649_v16 }
 0x263   : > { %v1420_v11 = vpop.eup %1419  ;;  %v652_v14 = vmul.f32 %v1418_v10, %v648_v13 }
 0x264   : > { %v1422_v12 = vpop.eup %1421  ;;  %v654_v22 = vmul.f32 %v1420_v11, %v650_v20 }
 0x265   : > { %v655_v27 = vmul.f32 %v1422_v12, %v651_v24 }
 0x270   : > { %692 = vperm.xlu0 %1405, %v1416_v1  }
 0x273   : > { %687 = vperm.xlu1 %1406, %v1418_v10  }
 0x277   : > { %697 = vperm.xlu1 %1406, %v1420_v11  }
 0x27b   : > { %702 = vperm.xlu1 %1406, %v1422_v12  }
 0x2e3   : > { %v658_v15 = vpop.xlane.xlu1 %657 }
 0x2e4   : > { %v668_v17 = vadd.f32 %v658_v15, %v652_v14 }
 0x2e6   : > { %673 = vst.msk [vmem:[#allocation4] sm:$0xff] %vm241_vm3, %v668_v17 }
 0x2e7   : > { %v661_v19 = vpop.xlane.xlu0 %660 }
 0x2e8   : > { %v669_v21 = vadd.f32 %v661_v19, %v653_v18 }
 0x2ea   : > { %674 = vst.msk [vmem:[#allocation4 + $0x8] sm:$0xff] %vm241_vm3, %v669_v21 }
 0x2eb   : > { %v664_v23 = vpop.xlane.xlu1 %663 }
 0x2ec   : > { %v670_v25 = vadd.f32 %v664_v23, %v654_v22 }
 0x2ed   : > { %v1016_v26 = vld [vmem:[#allocation4] sm:$0xff] }
 0x2ee   : > { %675 = vst.msk [vmem:[#allocation4 + $0x10] sm:$0xff] %vm241_vm3, %v670_v25  ;;  %1423 = vrcp.f32 %v1016_v26 }
 0x2ef   : > { %v667_v28 = vpop.xlane.xlu1 %666  ;;  %v693_v41 = vpop.permute.xlu0 %692 }
 0x2f0   : > { %v671_v29 = vadd.f32 %v667_v28, %v655_v27  ;;  %v706_v46 = vmul.f32 %v693_v41, %v682_v40 }
 0x2f1   : > { %v1017_v30 = vld [vmem:[#allocation4 + $0x8] sm:$0xff] }
 0x2f2   : > { %676 = vst.msk [vmem:[#allocation4 + $0x18] sm:$0xff] %vm241_vm3, %v671_v29  ;;  %1425 = vrcp.f32 %v1017_v30 }
 0x2f3   : > { %v688_v38 = vpop.permute.xlu1 %687 }
 0x2f4   : > { %v705_v39 = vmul.f32 %v688_v38, %v681_v37 }
 0x2f5   : > { %v1018_v31 = vld [vmem:[#allocation4 + $0x10] sm:$0xff] }
 0x2f6   : > { %1427 = vrcp.f32 %v1018_v31 }
 0x2f7   : > { %v698_v45 = vpop.permute.xlu1 %697 }
 0x2f8   : > { %v1424_v32 = vpop.eup %1423  ;;  %v707_v51 = vmul.f32 %v698_v45, %v683_v47 }
 0x2f9   : > { %1026 = vperm.xlu1 %1406, %v1424_v32   ;;  %v1019_v33 = vld [vmem:[#allocation4 + $0x18] sm:$0xff] }
 0x2fa   : > { %1429 = vrcp.f32 %v1019_v33 }
 0x2fb   : > { %v703_v53 = vpop.permute.xlu1 %702 }
 0x2fc   : > { %v1426_v34 = vpop.eup %1425  ;;  %v708_v57 = vmul.f32 %v703_v53, %v684_v52 }
 0x2fd   : > { %1031 = vperm.xlu0 %1405, %v1426_v34  }
 0x300   : > { %v1428_v35 = vpop.eup %1427 }
 0x301   : > { %1036 = vperm.xlu1 %1406, %v1428_v35  }
 0x304   : > { %v1430_v36 = vpop.eup %1429 }
 0x305   : > { %1041 = vperm.xlu0 %1405, %v1430_v36  }
 0x328   : > { %v778_v42 = vpop.f32.mrb[4].mxu0 }
 0x329   : > { %v1001_v43 = vadd.f32 %v778_v42, %v705_v39  ;;  %v1279_v44 = vpop.f32.mrb[5].mxu0 }
 0x32b   : > { %1005 = vst.msk [vmem:[#allocation2] sm:$0xff] %vm250_vm0, %v1001_v43 }
 0x32c   : > { %v851_v48 = vpop.f32.mrb[4].mxu1 }
 0x32d   : > { %v1002_v49 = vadd.f32 %v851_v48, %v706_v46  ;;  %v1286_v50 = vpop.f32.mrb[5].mxu1 }
 0x32f   : > { %1006 = vst.msk [vmem:[#allocation2 + $0x8] sm:$0xff] %vm250_vm0, %v1002_v49 }
 0x330   : > { %v924_v54 = vpop.f32.mrb[6].mxu0 }
 0x331   : > { %v1003_v55 = vadd.f32 %v924_v54, %v707_v51  ;;  %v1293_v56 = vpop.f32.mrb[7].mxu0 }
 0x332   : > { %v1012_v61 = vld [vmem:[#allocation2] sm:$0xff] }
 0x333   : > { %1007 = vst.msk [vmem:[#allocation2 + $0x10] sm:$0xff] %vm250_vm0, %v1003_v55 }
 0x334   : > { %v997_v58 = vpop.f32.mrb[6].mxu1 }
 0x335   : > { %v1004_v59 = vadd.f32 %v997_v58, %v708_v57  ;;  %v1300_v60 = vpop.f32.mrb[7].mxu1 }
 0x336   : > { %v1013_v0 = vld [vmem:[#allocation2 + $0x8] sm:$0xff] }
 0x337   : > { %1008 = vst.msk [vmem:[#allocation2 + $0x18] sm:$0xff] %vm250_vm0, %v1004_v59 }
 0x33a   : > { %v1014_v4 = vld [vmem:[#allocation2 + $0x10] sm:$0xff] }
 0x33e   : > { %v1015_v8 = vld [vmem:[#allocation2 + $0x18] sm:$0xff] }
 0x378   : > { %v1027_v62 = vpop.permute.xlu1 %1026 }
 0x379   : > { %v1044_v63 = vmul.f32 %v1027_v62, %v1012_v61 }
 0x37b   : > { %1048 = vst.msk [vmem:[%s232_s23] sm:$0xff] %vm250_vm0, %v1044_v63 }
 0x37c   : > { %v1032_v2 = vpop.permute.xlu0 %1031 }
 0x37d   : > { %v1045_v3 = vmul.f32 %v1032_v2, %v1013_v0 }
 0x37f   : > { %1049 = vst.msk [vmem:[%s232_s23 + $0x8] sm:$0xff] %vm250_vm0, %v1045_v3 }
 0x380   : > { %v1037_v5 = vpop.permute.xlu1 %1036 }
 0x381   : > { %v1046_v6 = vmul.f32 %v1037_v5, %v1014_v4 }
 0x383   : > { %1050 = vst.msk [vmem:[%s232_s23 + $0x10] sm:$0xff] %vm250_vm0, %v1046_v6 }
 0x384   : > { %v1042_v7 = vpop.permute.xlu0 %1041 }
 0x385   : > { %v1047_v9 = vmul.f32 %v1042_v7, %v1015_v8 }
 0x387   : > { %1051 = vst.msk [vmem:[%s232_s23 + $0x18] sm:$0xff] %vm250_vm0, %v1047_v9 }
 0x388   : > { %1504 = shalt.err (!%p1501_p11)
}
 0x389   : > { %s1505_s9 = scalar_lea.hbm %s1892_s11, 512  ;;  %s1509_s30 = scalar_lea.hbm %s1945_s3, 1024 }
 0x38a   : > { %p1506_p1 = scmp.ne.s32.totalorder %s1892_s11, %s1505_s9  ;;  %p1510_p5 = scmp.lt.u32.totalorder %s1892_s11, %s1945_s3 }
 0x38b   : > { %p1511_p4 = scmp.lt.u32.totalorder %s1509_s30, %s1505_s9  ;;  %p1513_p0 = scmp.lt.u32.totalorder %s1505_s9, %s1892_s11 }
 0x38c   : > { %p1507_p6 = pnand %p1506_p1, %p1958_p3 }
 0x38d   : > { %p1512_p8 = por %p1511_p4, %p1510_p5 }
 0x38e   : > { %p1508_p2 = pneg %p1507_p6 }
 0x38f   : > { %p1514_p12 = por %p1513_p0, %p1512_p8 }
 0x391   : > { %p1515_p13 = pnand %p1514_p12, %p1508_p2 }
 0x393   : > { %1518 = shalt.err (!%p1515_p13)
}
 0x394   : > { %s1589_s6 = smov 128   ;;  %s1590_s23 = smov 8  }
 0x395   : > { %1333 = dma.vmem_to_hbm [thread:$0]  (%p1958_p3), %s1886_s17, 512, %s1892_s11, %s1053_s18, %s1589_s6, %s1589_s6, %s1590_s23  }
 0x396 PF: > { %s1082_s21 = sand.u32 1, %s1557_s12   ;;  %p1959_p7 = scmp.ne.s32.totalorder %s1951_s26, 0 }
 0x397   : > { %p1960_p10 = scmp.ge.s32.totalorder %s1577_s16, 2  ;;  %s1083_s28 = scalar_lea.sflag [#allocation9], %s1082_s21 }
 0x399   : > { %p1343_p9 = pnand %p1960_p10, %p1959_p7 }
 0x39b   : > { %1552 = dma.done.wait (!%p1343_p9), %s1083_s28, 512  }
 0x39c   : > { %1554 = vsyncadd (!%p1343_p9), %s1083_s28, 4294966784  ;;  %s23_s16 = sadd.s32 1, %s1577_s16   ;;  %s1961_s12 = smov %s1561_s13 }
 0x39d   : > { %p20_p11 = scmp.ge.s32.totalorder %s23_s16, 4   ;;  %s1962_s13 = smov %s1565_s0 }
 0x39e   : > { %s1963_s0 = smov %s1667_s25  ;;  %s1964_s14 = smov %s1573_s15 }
 0x39f   : > { %s1965_s15 = smov %s1967_s19  ;;  %22 = sbr.rel (!%p20_p11) target bundleno = 8 (0x8), region = 94 }
 0x3a6   :  { %1088 = vsyncpa [#allocation8], 1 }
 0x3a7   :  { %1090 = vsyncpa [#allocation8 + $0x1], 1 }
 0x3a8   :  { %1091 = vsyncpa [#allocation11], 1 }
 0x3a9   :  { %1093 = vsyncpa [#allocation11 + $0x1], 1 }
 0x3aa   :  { %1094 = vsyncpa [#allocation9], 1 }
 0x3ab   :  { %1096 = vsyncpa [#allocation9 + $0x1], 1 }

</bundles_post_ra>
